<compile_context>
chip_gen: v7x
topology: tpu7x:2x2x1
jax: 0.10.0
libtpu: 0.0.40
codegen_flags: <defaults>
</compile_context>

<pallas_src>
import functools

import jax
import jax.numpy as jnp
from jax.experimental import pallas as pl
from jax.experimental.pallas import tpu as pltpu


def _round_up(x, m):
    return ((x + m - 1) // m) * m


def _vmem_capacity_bytes():
    try:
        return int(pltpu.get_tpu_info().vmem_capacity_bytes)
    except Exception:
        return 64 << 20  # conservative fallback (v7x-sized)


def _gap_kernel(x_ref, o_ref, acc_ref, *, hw, thw, lane_w, inv_hw, needs_mask):
    # x_ref:   (tr, thw) input tile in VMEM
    # o_ref:   (tr, 1)   output block (resident across the HW reduction axis)
    # acc_ref: (tr, lane_w) f32 accumulator scratch (VPU-only in the hot loop)
    k = pl.program_id(1)
    nk = pl.num_programs(1)

    @pl.when(k == 0)
    def _():
        acc_ref[...] = jnp.zeros_like(acc_ref)

    x = x_ref[...]

    def accumulate(xv):
        # Pure VPU adds over static lane-aligned slices; no per-chunk XLU work.
        part = xv[:, 0:lane_w].astype(jnp.float32)
        for p in range(1, thw // lane_w):
            part = part + xv[:, p * lane_w:(p + 1) * lane_w].astype(jnp.float32)
        acc_ref[...] += part

    if needs_mask:  # static Python bool: only emitted when HW % thw != 0
        # Only the final HW chunk can read past HW -> mask only there.
        @pl.when(k == nk - 1)
        def _():
            idx = jax.lax.broadcasted_iota(jnp.int32, x.shape, 1) + k * thw
            accumulate(jnp.where(idx < hw, x, jnp.zeros_like(x)))

        @pl.when(k != nk - 1)
        def _():
            accumulate(x)
    else:
        accumulate(x)

    @pl.when(k == nk - 1)
    def _():
        # One cross-lane reduce + scale + cast per output tile (epilogue only).
        s = jnp.sum(acc_ref[...], axis=-1, keepdims=True)
        o_ref[...] = (s * inv_hw).astype(o_ref.dtype)


def _choose_tiles(R, HW, itemsize, sub, vmem_cap):
    # HW chunk: full axis when it is small / lane-aligned, else a lane-aligned
    # multiple of 128 (the tail chunk gets masked in-kernel, last chunk only).
    thw_cap = 2048
    if HW <= 128:
        thw = HW
    elif HW % 128 == 0 and HW <= thw_cap:
        thw = HW
    else:
        thw = min((HW // 128) * 128, thw_cap)
    needs_mask = (HW % thw) != 0

    # Per-buffer input budget derived from VMEM capacity:
    #   v7x (64 MiB)  -> 8 MiB;  v5e/v6e (128 MiB) -> 16 MiB.
    budget = min(16 << 20, max(vmem_cap // 8, 2 << 20))
    row_bytes = _round_up(thw, 128) * itemsize
    max_rows = max(sub, (budget // row_bytes) // sub * sub)

    if R <= max_rows:
        tr = R  # block == full dim: always legal
        # Expose >= 2 blocks on the parallel axis so v7x megacore has work for
        # both TensorCores (guarded so small inputs stay a single full block).
        if R >= 2 * sub:
            half = _round_up((R + 1) // 2, sub)
            if half < R:
                tr = half
    else:
        tr = max_rows  # multiple of the dtype's sublane tile
    return tr, thw, needs_mask


def global_avg_pool2d(x):
    """x: (N, C, H, W) NCHW -> (N, C), mean over H and W (same dtype as x)."""
    N, C, H, W = x.shape
    HW = H * W
    R = N * C
    x2 = x.reshape(R, HW)  # free view: contiguous NCHW -> (N*C, HW)

    itemsize = jnp.dtype(x.dtype).itemsize
    sub = {4: 8, 2: 16, 1: 32}.get(itemsize, 8)  # sublane tile for this dtype
    vmem_cap = _vmem_capacity_bytes()

    tr, thw, needs_mask = _choose_tiles(R, HW, itemsize, sub, vmem_cap)
    lane_w = 128 if thw % 128 == 0 else thw  # thw < 128 only when thw == HW
    grid = (pl.cdiv(R, tr), pl.cdiv(HW, thw))

    kernel = functools.partial(
        _gap_kernel, hw=HW, thw=thw, lane_w=lane_w,
        inv_hw=1.0 / float(HW), needs_mask=needs_mask)

    # VMEM budget: double-buffered (padded) input tiles + output blocks +
    # accumulator (+ one acc-sized temp for the in-register partial sums).
    in_tile = _round_up(tr, sub) * _round_up(thw, 128) * itemsize
    out_tile = _round_up(tr, sub) * 128 * itemsize
    acc_tile = _round_up(tr, 8) * _round_up(lane_w, 128) * 4
    need = 2 * in_tile + 2 * out_tile + 2 * acc_tile
    cap75 = max(int(0.75 * vmem_cap), 32 << 20)
    vmem_limit = int(min(max(need + (4 << 20), 32 << 20), cap75))

    grid_spec = pltpu.PrefetchScalarGridSpec(
        num_scalar_prefetch=0,
        grid=grid,
        in_specs=[pl.BlockSpec((tr, thw), lambda i, k: (i, k))],
        out_specs=pl.BlockSpec((tr, 1), lambda i, k: (i, 0)),
        scratch_shapes=[pltpu.VMEM((tr, lane_w), jnp.float32)],
    )

    cost = pl.CostEstimate(
        flops=R * HW,
        transcendentals=0,
        bytes_accessed=R * HW * itemsize + R * itemsize,
    )

    out2 = pl.pallas_call(
        kernel,
        out_shape=jax.ShapeDtypeStruct((R, 1), x.dtype),
        grid_spec=grid_spec,
        compiler_params=pltpu.CompilerParams(
            dimension_semantics=("parallel", "arbitrary"),
            vmem_limit_bytes=vmem_limit,
        ),
        cost_estimate=cost,
    )(x2)
    return out2.reshape(N, C)


if __name__ == "__main__":
    key = jax.random.PRNGKey(0)

    # Primary (module-consistent small shape): N=2, C=4, H=W=16.
    N, C, H, W = 2, 4, 16, 16
    x = jax.random.normal(key, (N, C, H, W), dtype=jnp.float32)
    out = jax.block_until_ready(global_avg_pool2d(x))
    ref = jnp.mean(x, axis=(2, 3))
    assert out.shape == (N, C)
    assert out.dtype == x.dtype
    assert jnp.allclose(out, ref, atol=1e-5, rtol=1e-5)

    # Secondary sanity check: multi-chunk HW + gated tail mask (HW=144, thw=128).
    x2 = jax.random.normal(jax.random.PRNGKey(0), (3, 5, 12, 12), dtype=jnp.float32)
    out2 = jax.block_until_ready(global_avg_pool2d(x2))
    ref2 = jnp.mean(x2, axis=(2, 3))
    assert jnp.allclose(out2, ref2, atol=1e-5, rtol=1e-5)

    print("KERNEL_OK")
</pallas_src>

<mosaic_0001>
module attributes {stable_mosaic.version = 11 : i64} {
  func.func @_gap_kernel(%arg0: i32, %arg1: i32, %arg2: memref<8x256xf32, #tpu.memory_space<vmem>>, %arg3: memref<8x1xf32, #tpu.memory_space<vmem>>, %arg4: memref<8x128xf32, #tpu.memory_space<vmem>>) attributes {dimension_semantics = [#tpu.dimension_semantics<parallel>, #tpu.dimension_semantics<arbitrary>], iteration_bounds = array<i64: 1, 1>, scalar_prefetch = 0 : i64, scratch_operands = 1 : i64, tpu.core_type = #tpu.core_type<tc>, window_params = [{transform_indices = @transform_0, window_bounds = array<i64: 8, 256>}, {transform_indices = @transform_1, window_bounds = array<i64: 8, 1>}]} {
    %c0_i32 = arith.constant 0 : i32
    %0 = arith.cmpi eq, %arg1, %c0_i32 : i32
    %1 = arith.extui %0 : i1 to i32
    %c0_i32_0 = arith.constant 0 : i32
    %2 = arith.cmpi ne, %1, %c0_i32_0 : i32
    scf.if %2 {
      %cst = arith.constant 0.000000e+00 : f32
      %13 = vector.broadcast %cst : f32 to vector<8x128xf32>
      %c0_8 = arith.constant 0 : index
      %c0_9 = arith.constant 0 : index
      %14 = vector.load %arg4[%c0_8, %c0_9] : memref<8x128xf32, #tpu.memory_space<vmem>>, vector<8x128xf32>
      tpu.vector_store %arg4[%c0_8, %c0_9], %13 {strides = array<i32>} : memref<8x128xf32, #tpu.memory_space<vmem>>, vector<8x128xf32>,
    } else {
    }
    %c0 = arith.constant 0 : index
    %c0_1 = arith.constant 0 : index
    %3 = vector.load %arg2[%c0, %c0_1] : memref<8x256xf32, #tpu.memory_space<vmem>>, vector<8x256xf32>
    %4 = vector.extract_strided_slice %3 {offsets = [0, 0], sizes = [8, 128], strides = [1, 1]} : vector<8x256xf32> to vector<8x128xf32>
    %5 = vector.extract_strided_slice %3 {offsets = [0, 128], sizes = [8, 128], strides = [1, 1]} : vector<8x256xf32> to vector<8x128xf32>
    %6 = arith.addf %4, %5 : vector<8x128xf32>
    %c0_2 = arith.constant 0 : index
    %c0_3 = arith.constant 0 : index
    %7 = vector.load %arg4[%c0_2, %c0_3] : memref<8x128xf32, #tpu.memory_space<vmem>>, vector<8x128xf32>
    %8 = arith.addf %7, %6 : vector<8x128xf32>
    %c0_4 = arith.constant 0 : index
    %c0_5 = arith.constant 0 : index
    %9 = vector.load %arg4[%c0_4, %c0_5] : memref<8x128xf32, #tpu.memory_space<vmem>>, vector<8x128xf32>
    tpu.vector_store %arg4[%c0_4, %c0_5], %8 {strides = array<i32>} : memref<8x128xf32, #tpu.memory_space<vmem>>, vector<8x128xf32>,
    %c0_i32_6 = arith.constant 0 : i32
    %10 = arith.cmpi eq, %arg1, %c0_i32_6 : i32
    %11 = arith.extui %10 : i1 to i32
    %c0_i32_7 = arith.constant 0 : i32
    %12 = arith.cmpi ne, %11, %c0_i32_7 : i32
    scf.if %12 {
      %c0_8 = arith.constant 0 : index
      %c0_9 = arith.constant 0 : index
      %13 = vector.load %arg4[%c0_8, %c0_9] : memref<8x128xf32, #tpu.memory_space<vmem>>, vector<8x128xf32>
      %cst = arith.constant dense<0.000000e+00> : vector<8xf32>
      %14 = vector.multi_reduction <add>, %13, %cst [1] : vector<8x128xf32> to vector<8xf32>
      %15 = vector.shape_cast %14 : vector<8xf32> to vector<8x1xf32>
      %cst_10 = arith.constant 3.906250e-03 : f32
      %16 = vector.broadcast %cst_10 : f32 to vector<8x1xf32>
      %17 = arith.mulf %15, %16 : vector<8x1xf32>
      %c0_11 = arith.constant 0 : index
      %c0_12 = arith.constant 0 : index
      %18 = vector.load %arg3[%c0_11, %c0_12] : memref<8x1xf32, #tpu.memory_space<vmem>>, vector<8x1xf32>
      tpu.vector_store %arg3[%c0_11, %c0_12], %17 {strides = array<i32>} : memref<8x1xf32, #tpu.memory_space<vmem>>, vector<8x1xf32>,
    } else {
    }
    return
  }
  func.func @transform_0(%arg0: i32, %arg1: i32) -> (i32, i32) {
    %c0_i32 = arith.constant 0 : i32
    return %arg0, %arg1 : i32, i32
  }
  func.func @transform_1(%arg0: i32, %arg1: i32) -> (i32, i32) {
    %c0_i32 = arith.constant 0 : i32
    %c0_i32_0 = arith.constant 0 : i32
    return %arg0, %c0_i32 : i32, i32
  }
}

</mosaic_0001>

<bundles_post_ra>
// kernel: tpu_custom_call.1
= control target key start
LH: loop header
LB: loop body
LE: loop exit
PB: predicated region body
PF: predicated region fallthrough
CT: control target
= control target key end

     0   :  { %6 = vsyncpa [#allocation4], 0  ;;  %s70_s6 = smov [#allocation3]   ;;  %s96_s0 = inlined_call_operand.hbm [shape: f32[8,256], index: 0, kind: input, shape index: {}]   ;;  %s97_s1 = inlined_call_operand.vmem [shape: f32[8,1], index: 1, kind: output, shape index: {}]  }
   0x1   :  { %s13_s7 = sshll.u32 %s70_s6, 4  ;;  %s46_s10 = scalar_lea.hbm %s96_s0, 256  ;;  %s14_s7 = int_to_ptr.vmem [resolvable:$true] %s13_s7 }
   0x2   :  { %p47_p0 = scmp.ne.s32.totalorder %s96_s0, %s46_s10  ;;  %p50_p1 = scmp.lt.u32.totalorder %s46_s10, %s96_s0 }
   0x4   :  { %p52_p2 = pnand %p50_p1, %p47_p0 }
   0x6   :  { %55 = shalt.err (!%p52_p2)
}
   0x7   :  { %s56_s15 = scalar_lea.vmem %s14_s7, 256  ;;  %p61_p4 = scmp.lt.s32.totalorder %s14_s7, %s14_s7 }
   0x8   :  { %p57_p3 = scmp.ne.s32.totalorder %s14_s7, %s56_s15  ;;  %p62_p5 = scmp.lt.s32.totalorder %s56_s15, %s56_s15 }
   0xa   :  { %p63_p6 = por %p62_p5, %p61_p4 }
   0xc   :  { %p64_p7 = pnand %p63_p6, %p57_p3 }
   0xe   :  { %67 = shalt.err (!%p64_p7)
}
   0xf   :  { %16 = dma.hbm_to_vmem [thread:$0]  %s96_s0, 256, %s14_s7, [#allocation4]  }
  0x10   :  { %68 = dma.done.wait [#allocation4], 256  }
  0x11   :  { %69 = vsyncadd [#allocation4], 4294967040  ;;  %v25_v0 = vld [vmem:[#allocation3] sm:$0xff]  ;;  %v26_v1 = vld [vmem:[#allocation3 + $0x8] sm:$0xff]  ;;  %vm38_vm0 = vcmask 7168  }
  0x12   :  { %v27_v2 = vadd.f32 %v26_v1, %v25_v0 }
  0x14   :  { %35 = vadd.xlane.f32.xlu0 %v27_v2 }
  0xa1   :  { %v36_v3 = vpop.xlane.xlu0 %35 }
  0xa2   :  { %v37_v4 = vmul.f32 0.00390625, %v36_v3 }
  0xa4   :  { %39 = vst.msk [vmem:[%s97_s1] sm:$0xff] %vm38_vm0, %v37_v4 }
  0xa5   :  { %44 = vsyncpa [#allocation4], 1 }

</bundles_post_ra>
